<compile_context>
chip_gen: v7x
topology: tpu7x:2x2x1
jax: 0.10.0
libtpu: 0.0.40
codegen_flags: <defaults>
</compile_context>

<pallas_src>
import functools

import jax
import jax.numpy as jnp
from jax.experimental import pallas as pl
from jax.experimental.pallas import tpu as pltpu


# ----------------------------------------------------------------------------
# small helpers traced inside kernels
# ----------------------------------------------------------------------------
def _layernorm(x, g, b, eps):
    x = x.astype(jnp.float32)
    mean = jnp.mean(x, axis=-1, keepdims=True)
    var = jnp.mean(jnp.square(x - mean), axis=-1, keepdims=True)
    return (x - mean) * jax.lax.rsqrt(var + eps) * g + b


def _bf16_dot(a, b):
    # MXU matmul: bf16 operands, f32 accumulation.
    return jnp.dot(a.astype(jnp.bfloat16), b.astype(jnp.bfloat16),
                   preferred_element_type=jnp.float32)


# ----------------------------------------------------------------------------
# Fused transformer-encoder kernel
#   grid = (B, L):  batch "parallel", layer "arbitrary" (sequential carry).
#   Scratch x_sc holds the (S, D) activations across the layer sweep.
#   At the last layer: final LN on the selected token, projection to the
#   embedding dim, L2-normalize, write (1, 1, E) output block.
# ----------------------------------------------------------------------------
def _encoder_kernel(
    sel_ref,                      # (B,)  int32 scalar prefetch: token row per batch
    x_ref,                        # (1, S, D)   f32 input sequence
    ln1g_ref, ln1b_ref,           # (1, 1, D)   f32
    qkvw_ref, qkvb_ref,           # (1, D, 3D) bf16 / (1, 1, 3D) f32
    projw_ref, projb_ref,         # (1, D, D)  bf16 / (1, 1, D)  f32
    ln2g_ref, ln2b_ref,           # (1, 1, D)   f32
    fc1w_ref, fc1b_ref,           # (1, D, 4D) bf16 / (1, 1, 4D) f32
    fc2w_ref, fc2b_ref,           # (1, 4D, D) bf16 / (1, 1, D)  f32
    lnfg_ref, lnfb_ref,           # (1, D)      f32  final LayerNorm
    headw_ref,                    # (D, E)     bf16  embedding projection
    o_ref,                        # (1, 1, E)   f32  L2-normalized embedding
    x_sc,                         # VMEM (S, D) f32  activations (layer carry)
    *, heads, head_dim, seq, causal, ln_eps, norm_eps):

    b = pl.program_id(0)
    l = pl.program_id(1)
    n_layers = pl.num_programs(1)
    D = heads * head_dim
    scale = head_dim ** -0.5

    @pl.when(l == 0)
    def _():
        x_sc[...] = x_ref[0].astype(jnp.float32)

    x = x_sc[...]                                             # (S, D) f32

    # ---- pre-LN multi-head self-attention ----
    h = _layernorm(x, ln1g_ref[0], ln1b_ref[0], ln_eps)
    qkv = _bf16_dot(h, qkvw_ref[0]) + qkvb_ref[0]             # (S, 3D) f32

    if causal:
        row = jax.lax.broadcasted_iota(jnp.int32, (seq, seq), 0)
        col = jax.lax.broadcasted_iota(jnp.int32, (seq, seq), 1)
        mask = jnp.where(col <= row, 0.0, -1e9).astype(jnp.float32)

    attn_proj = jnp.zeros((seq, D), jnp.float32)
    for hh in range(heads):                                   # static, tiny
        lo, hi = hh * head_dim, (hh + 1) * head_dim
        qh = qkv[:, lo:hi]                                    # (S, Dh)
        kh = qkv[:, D + lo:D + hi]
        vh = qkv[:, 2 * D + lo:2 * D + hi]
        s = jax.lax.dot_general(
            qh.astype(jnp.bfloat16), kh.astype(jnp.bfloat16),
            (((1,), (1,)), ((), ())),
            preferred_element_type=jnp.float32) * scale       # (S, S)
        if causal:
            s = s + mask
        s = s - jnp.max(s, axis=-1, keepdims=True)
        p = jnp.exp(s)
        p = p * pl.reciprocal(jnp.sum(p, axis=-1, keepdims=True), approx=True)
        oh = _bf16_dot(p, vh)                                 # (S, Dh)
        # fold the output projection in per head (no lane concat needed)
        attn_proj = attn_proj + _bf16_dot(oh, projw_ref[0, lo:hi, :])
    x = x + attn_proj + projb_ref[0]

    # ---- pre-LN MLP ----
    h = _layernorm(x, ln2g_ref[0], ln2b_ref[0], ln_eps)
    h = _bf16_dot(h, fc1w_ref[0]) + fc1b_ref[0]
    # TODO(synk): PyTorch nn.GELU default is exact erf GELU; tanh approx used here.
    h = jax.nn.gelu(h, approximate=True)
    x = x + _bf16_dot(h, fc2w_ref[0]) + fc2b_ref[0]

    x_sc[...] = x

    # ---- epilogue: final LN on selected token, projection, L2-normalize ----
    @pl.when(l == n_layers - 1)
    def _():
        idx = sel_ref[b]
        r = x_sc[pl.ds(idx, 1), :]                            # (1, D)
        r = _layernorm(r, lnfg_ref[...], lnfb_ref[...], ln_eps)
        e = _bf16_dot(r, headw_ref[...])                      # (1, E) f32
        nsq = jnp.sum(e * e, axis=-1, keepdims=True)
        # F.normalize: x / max(||x||, eps)  ==  x * rsqrt(max(||x||^2, eps^2))
        o_ref[0] = (e * jax.lax.rsqrt(jnp.maximum(nsq, norm_eps * norm_eps))
                    ).astype(o_ref.dtype)


def transformer_encode(x, p, sel, *, heads, causal, embed_dim,
                       ln_eps=1e-5, norm_eps=1e-12):
    """x: (B, S, D) f32 embedded sequence; sel: (B,) int32 token row to pool.
    Returns L2-normalized (B, embed_dim) f32 embeddings in ONE pallas_call."""
    B, S, D = x.shape
    L = p["qkv_w"].shape[0]
    head_dim = D // heads
    E = embed_dim

    kern = functools.partial(
        _encoder_kernel, heads=heads, head_dim=head_dim, seq=S,
        causal=causal, ln_eps=ln_eps, norm_eps=norm_eps)

    lyr = lambda b, l, sel_ref: (l, 0, 0)        # per-layer stacked params
    fixed = lambda b, l, sel_ref: (0, 0)         # shared params

    out = pl.pallas_call(
        kern,
        out_shape=jax.ShapeDtypeStruct((B, 1, E), jnp.float32),
        grid_spec=pltpu.PrefetchScalarGridSpec(
            num_scalar_prefetch=1,
            grid=(B, L),
            in_specs=[
                pl.BlockSpec((1, S, D), lambda b, l, sel_ref: (b, 0, 0)),  # x
                pl.BlockSpec((1, 1, D), lyr),        # ln1_g
                pl.BlockSpec((1, 1, D), lyr),        # ln1_b
                pl.BlockSpec((1, D, 3 * D), lyr),    # qkv_w
                pl.BlockSpec((1, 1, 3 * D), lyr),    # qkv_b
                pl.BlockSpec((1, D, D), lyr),        # proj_w
                pl.BlockSpec((1, 1, D), lyr),        # proj_b
                pl.BlockSpec((1, 1, D), lyr),        # ln2_g
                pl.BlockSpec((1, 1, D), lyr),        # ln2_b
                pl.BlockSpec((1, D, 4 * D), lyr),    # fc1_w
                pl.BlockSpec((1, 1, 4 * D), lyr),    # fc1_b
                pl.BlockSpec((1, 4 * D, D), lyr),    # fc2_w
                pl.BlockSpec((1, 1, D), lyr),        # fc2_b
                pl.BlockSpec((1, D), fixed),         # final LN gamma
                pl.BlockSpec((1, D), fixed),         # final LN beta
                pl.BlockSpec((D, E), fixed),         # embedding projection
            ],
            out_specs=pl.BlockSpec((1, 1, E), lambda b, l, sel_ref: (b, 0, 0)),
            scratch_shapes=[pltpu.VMEM((S, D), jnp.float32)],
        ),
        compiler_params=pltpu.CompilerParams(
            dimension_semantics=("parallel", "arbitrary")),
    )(
        sel, x,
        p["ln1_g"], p["ln1_b"], p["qkv_w"], p["qkv_b"],
        p["proj_w"], p["proj_b"], p["ln2_g"], p["ln2_b"],
        p["fc1_w"], p["fc1_b"], p["fc2_w"], p["fc2_b"],
        p["lnf_g"], p["lnf_b"], p["head_w"],
    )
    return out.reshape(B, E)


# ----------------------------------------------------------------------------
# Patch-embedding matmul (stride-p conv rewritten as patches @ W + b).
# Runs once per image batch; tiny, single-block.
# ----------------------------------------------------------------------------
def _patch_embed_kernel(x_ref, w_ref, b_ref, o_ref):
    y = jnp.dot(x_ref[...].astype(jnp.bfloat16), w_ref[...],
                preferred_element_type=jnp.float32) + b_ref[...]
    o_ref[...] = y.astype(o_ref.dtype)


def patch_embed(patches, w, b):
    """patches: (M, K) f32, w: (K, N) bf16, b: (1, N) f32 -> (M, N) f32."""
    M, K = patches.shape
    N = w.shape[1]
    return pl.pallas_call(
        _patch_embed_kernel,
        out_shape=jax.ShapeDtypeStruct((M, N), jnp.float32),
        grid=(1,),
        in_specs=[
            pl.BlockSpec((M, K), lambda i: (0, 0)),
            pl.BlockSpec((K, N), lambda i: (0, 0)),
            pl.BlockSpec((1, N), lambda i: (0, 0)),
        ],
        out_specs=pl.BlockSpec((M, N), lambda i: (0, 0)),
    )(patches, w, b)


# ----------------------------------------------------------------------------
# Model (glue in plain JAX; all transformer compute in the fused kernel)
# ----------------------------------------------------------------------------
CFG = dict(
    image_size=16,
    patch_size=8,
    in_chans=3,
    vision_width=32,
    vision_heads=2,
    vision_layers=2,
    vocab_size=64,
    context_length=8,
    text_width=32,
    text_heads=2,
    text_layers=2,
    embed_dim=16,
)


class SLIPPallas:
    """Pallas implementation of SLIP.encode_images / SLIP.encode_texts."""

    def __init__(self, params, cfg=CFG):
        self.p = params
        self.cfg = cfg

    # images: (B, 3, H, W) NCHW, float32
    def encode_images(self, images):
        c = self.cfg
        p = self.p["vision"]
        B = images.shape[0]
        ps, D = c["patch_size"], c["vision_width"]
        gh = c["image_size"] // ps
        n_patches = gh * gh

        # stride-p conv == patch extraction (layout glue) + Pallas matmul,
        # channel-major flatten matching Conv2d weight layout (out, C, p, p).
        x = images.reshape(B, c["in_chans"], gh, ps, gh, ps)
        x = x.transpose(0, 2, 4, 1, 3, 5).reshape(
            B * n_patches, c["in_chans"] * ps * ps)
        x = patch_embed(x, p["patch_w"], p["patch_b"]).reshape(B, n_patches, D)

        cls = jnp.broadcast_to(p["cls"], (B, 1, D))
        x = jnp.concatenate([cls, x], axis=1) + p["pos"]      # (B, S, D)

        sel = jnp.zeros((B,), jnp.int32)                      # class token (row 0)
        return transformer_encode(
            x, p, sel, heads=c["vision_heads"], causal=False,
            embed_dim=c["embed_dim"])

    # tokens: (B, context_length) int32 token ids (EOT = argmax token id, CLIP-style)
    def encode_texts(self, tokens):
        c = self.cfg
        p = self.p["text"]
        B, S = tokens.shape

        # TODO(synk): token-embedding gather stays in plain JAX (no clean Pallas gather here).
        x = jnp.take(p["tok_emb"], tokens, axis=0) + p["pos"]  # (B, S, D)

        sel = jnp.argmax(tokens, axis=-1).astype(jnp.int32)    # EOT position
        return transformer_encode(
            x, p, sel, heads=c["text_heads"], causal=True,
            embed_dim=c["embed_dim"])


# ----------------------------------------------------------------------------
# Deterministic parameter construction (synthetic; no checkpoint load)
# Weights feeding the MXU are stored as bf16; LN params / biases / embeddings f32.
# Per-layer params are stacked along a leading layer axis for the layer grid.
# ----------------------------------------------------------------------------
def init_params(key, cfg=CFG):
    keys = iter(jax.random.split(key, 64))

    def nrm(shape, std=0.02, dtype=jnp.float32):
        return (std * jax.random.normal(next(keys), shape, jnp.float32)).astype(dtype)

    def stacked_blocks(L, D):
        return dict(
            ln1_g=jnp.ones((L, 1, D), jnp.float32),
            ln1_b=jnp.zeros((L, 1, D), jnp.float32),
            qkv_w=nrm((L, D, 3 * D), dtype=jnp.bfloat16),
            qkv_b=jnp.zeros((L, 1, 3 * D), jnp.float32),
            proj_w=nrm((L, D, D), dtype=jnp.bfloat16),
            proj_b=jnp.zeros((L, 1, D), jnp.float32),
            ln2_g=jnp.ones((L, 1, D), jnp.float32),
            ln2_b=jnp.zeros((L, 1, D), jnp.float32),
            fc1_w=nrm((L, D, 4 * D), dtype=jnp.bfloat16),
            fc1_b=jnp.zeros((L, 1, 4 * D), jnp.float32),
            fc2_w=nrm((L, 4 * D, D), dtype=jnp.bfloat16),
            fc2_b=jnp.zeros((L, 1, D), jnp.float32),
        )

    ps = cfg["patch_size"]
    Dv, Dt, E = cfg["vision_width"], cfg["text_width"], cfg["embed_dim"]
    n_patches = (cfg["image_size"] // ps) ** 2

    vision = dict(
        patch_w=nrm((cfg["in_chans"] * ps * ps, Dv), dtype=jnp.bfloat16),
        patch_b=jnp.zeros((1, Dv), jnp.float32),
        cls=nrm((1, 1, Dv)),
        pos=nrm((1, n_patches + 1, Dv)),
        lnf_g=jnp.ones((1, Dv), jnp.float32),
        lnf_b=jnp.zeros((1, Dv), jnp.float32),
        head_w=nrm((Dv, E), dtype=jnp.bfloat16),
        **stacked_blocks(cfg["vision_layers"], Dv),
    )
    text = dict(
        tok_emb=nrm((cfg["vocab_size"], Dt)),
        pos=nrm((1, cfg["context_length"], Dt)),
        lnf_g=jnp.ones((1, Dt), jnp.float32),
        lnf_b=jnp.zeros((1, Dt), jnp.float32),
        head_w=nrm((Dt, E), dtype=jnp.bfloat16),
        **stacked_blocks(cfg["text_layers"], Dt),
    )
    return dict(vision=vision, text=text)


if __name__ == "__main__":
    params = init_params(jax.random.PRNGKey(0))
    model = SLIPPallas(params)

    k_img, k_txt = jax.random.split(jax.random.PRNGKey(0))
    images = jax.random.normal(k_img, (2, 3, 16, 16), jnp.float32)   # NCHW
    tokens = jax.random.randint(k_txt, (2, 8), 0, CFG["vocab_size"], jnp.int32)

    img_emb = model.encode_images(images)
    txt_emb = model.encode_texts(tokens)
    jax.block_until_ready((img_emb, txt_emb))

    assert img_emb.shape == (2, CFG["embed_dim"])
    assert txt_emb.shape == (2, CFG["embed_dim"])
    assert bool(jnp.all(jnp.isfinite(img_emb))) and bool(jnp.all(jnp.isfinite(txt_emb)))
    # embeddings are L2-normalized (F.normalize semantics)
    assert bool(jnp.allclose(jnp.linalg.norm(img_emb, axis=-1), 1.0, atol=1e-4))
    assert bool(jnp.allclose(jnp.linalg.norm(txt_emb, axis=-1), 1.0, atol=1e-4))

    print("KERNEL_OK")
</pallas_src>

<mosaic_0001>
module attributes {stable_mosaic.version = 11 : i64} {
  func.func @_patch_embed_kernel(%arg0: i32, %arg1: memref<8x192xf32, #tpu.memory_space<vmem>>, %arg2: memref<192x32xbf16, #tpu.memory_space<vmem>>, %arg3: memref<1x32xf32, #tpu.memory_space<vmem>>, %arg4: memref<8x32xf32, #tpu.memory_space<vmem>>) attributes {dimension_semantics = [#tpu.dimension_semantics<arbitrary>], iteration_bounds = array<i64: 1>, scalar_prefetch = 0 : i64, scratch_operands = 0 : i64, tpu.core_type = #tpu.core_type<tc>, window_params = [{pipeline_mode = #tpu.pipeline_mode<synchronous>, transform_indices = @transform_0, window_bounds = array<i64: 8, 192>}, {pipeline_mode = #tpu.pipeline_mode<synchronous>, transform_indices = @transform_1, window_bounds = array<i64: 192, 32>}, {pipeline_mode = #tpu.pipeline_mode<synchronous>, transform_indices = @transform_2, window_bounds = array<i64: 1, 32>}, {pipeline_mode = #tpu.pipeline_mode<synchronous>, transform_indices = @transform_3, window_bounds = array<i64: 8, 32>}]} {
    %c0 = arith.constant 0 : index
    %c0_0 = arith.constant 0 : index
    %0 = vector.load %arg1[%c0, %c0_0] : memref<8x192xf32, #tpu.memory_space<vmem>>, vector<8x192xf32>
    %1 = arith.truncf %0 : vector<8x192xf32> to vector<8x192xbf16>
    %c0_1 = arith.constant 0 : index
    %c0_2 = arith.constant 0 : index
    %2 = vector.load %arg2[%c0_1, %c0_2] : memref<192x32xbf16, #tpu.memory_space<vmem>>, vector<192x32xbf16>
    %cst = arith.constant dense<0.000000e+00> : vector<8x32xf32>
    %3 = tpu.matmul %1, %2, %cst {dimension_numbers = #tpu.dot_dimension_numbers<[1], [0], [0], [1], [0, 0, 1, 1], [], []>} : vector<8x192xbf16>, vector<192x32xbf16>, vector<8x32xf32> -> vector<8x32xf32>
    %c0_3 = arith.constant 0 : index
    %c0_4 = arith.constant 0 : index
    %4 = vector.load %arg3[%c0_3, %c0_4] : memref<1x32xf32, #tpu.memory_space<vmem>>, vector<1x32xf32>
    %5 = vector.broadcast %4 : vector<1x32xf32> to vector<8x32xf32>
    %6 = arith.addf %3, %5 : vector<8x32xf32>
    %c0_5 = arith.constant 0 : index
    %c0_6 = arith.constant 0 : index
    %7 = vector.load %arg4[%c0_5, %c0_6] : memref<8x32xf32, #tpu.memory_space<vmem>>, vector<8x32xf32>
    tpu.vector_store %arg4[%c0_5, %c0_6], %6 {strides = array<i32>} : memref<8x32xf32, #tpu.memory_space<vmem>>, vector<8x32xf32>,
    return
  }
  func.func @transform_0(%arg0: i32) -> (i32, i32) {
    %c0_i32 = arith.constant 0 : i32
    %c0_i32_0 = arith.constant 0 : i32
    %c0_i32_1 = arith.constant 0 : i32
    return %c0_i32, %c0_i32_0 : i32, i32
  }
  func.func @transform_1(%arg0: i32) -> (i32, i32) {
    %c0_i32 = arith.constant 0 : i32
    %c0_i32_0 = arith.constant 0 : i32
    %c0_i32_1 = arith.constant 0 : i32
    return %c0_i32, %c0_i32_0 : i32, i32
  }
  func.func @transform_2(%arg0: i32) -> (i32, i32) {
    %c0_i32 = arith.constant 0 : i32
    %c0_i32_0 = arith.constant 0 : i32
    %c0_i32_1 = arith.constant 0 : i32
    return %c0_i32, %c0_i32_0 : i32, i32
  }
  func.func @transform_3(%arg0: i32) -> (i32, i32) {
    %c0_i32 = arith.constant 0 : i32
    %c0_i32_0 = arith.constant 0 : i32
    %c0_i32_1 = arith.constant 0 : i32
    return %c0_i32, %c0_i32_0 : i32, i32
  }
}

</mosaic_0001>

<bundles_post_ra>
// kernel: tpu_custom_call.1
= control target key start
LH: loop header
LB: loop body
LE: loop exit
PB: predicated region body
PF: predicated region fallthrough
CT: control target
= control target key end

     0   :  { %v235_v1 = vmov 0   ;;  %vm123_vm0 = vcmask 523264   ;;  %s314_s0 = inlined_call_operand.vmem [shape: f32[8,192], index: 0, kind: input, shape index: {}]   ;;  %s315_s1 = inlined_call_operand.vmem [shape: bf16[192,32], index: 1, kind: input, shape index: {}]   ;;  %s316_s2 = inlined_call_operand.vmem [shape: f32[1,32], index: 2, kind: input, shape index: {}]   ;;  %s317_s3 = inlined_call_operand.hbm [shape: f32[8,32], index: 3, kind: output, shape index: {}]  }
   0x1   :  { %v199_v0 = vld [vmem:[%s315_s1] sm:$0xff]   ;;  %127 = vmatprep.subr.bf16.mxu0 %v235_v1  ;;  %v200_v2 = vld [vmem:[%s315_s1 + $0x8] sm:$0xff]   ;;  %v201_v3 = vld [vmem:[%s315_s1 + $0x10] sm:$0xff]  }
   0x2   :  { %128 = vmatpush1.bf16.msra.mxu0 %v199_v0  ;;  %v202_v4 = vld [vmem:[%s315_s1 + $0x18] sm:$0xff]   ;;  %v17_v5 = vld [vmem:[%s314_s0 + $0x8] sm:$0xff] }
   0x3   :  { %129 = vmatprep.subr.bf16.mxu0 %v235_v1  ;;  %v19_v6 = vpack.c.bf16 %v17_v5, %v17_v5 }
   0x6   :  { %130 = vmatpush1.bf16.msra.mxu0 %v200_v2 }
   0x7   :  { %131 = vmatprep.subr.bf16.mxu0 %v235_v1 }
   0xa   :  { %132 = vmatpush1.bf16.msra.mxu0 %v201_v3 }
   0xb   :  { %133 = vmatprep.subr.bf16.mxu0 %v235_v1 }
   0xc   :  { %8 = vsyncpa [#allocation3], 0  ;;  %v203_v7 = vld [vmem:[%s315_s1 + $0x20] sm:$0xff]   ;;  %196 = vmatprep.mubr.msk.bf16.mxu0 %vm123_vm0, %v19_v6  ;;  %v204_v8 = vld [vmem:[%s315_s1 + $0x28] sm:$0xff]   ;;  %s236_s15 = smov [#allocation2]   ;;  %vm167_vm1 = vcmask 261120  }
   0xd   :  { %v205_v9 = vld [vmem:[%s315_s1 + $0x30] sm:$0xff]   ;;  %v206_v10 = vld [vmem:[%s315_s1 + $0x38] sm:$0xff]   ;;  %v207_v11 = vld [vmem:[%s315_s1 + $0x40] sm:$0xff]   ;;  %s175_s16 = sshll.u32 %s236_s15, 4  ;;  %s176_s16 = int_to_ptr.vmem [resolvable:$true] %s175_s16 }
   0xe   :  { %134 = vmatpush1.bf16.msra.mxu0 %v202_v4  ;;  %v208_v12 = vld [vmem:[%s315_s1 + $0x48] sm:$0xff]   ;;  %v209_v13 = vld [vmem:[%s315_s1 + $0x50] sm:$0xff]   ;;  %v210_v14 = vld [vmem:[%s315_s1 + $0x58] sm:$0xff]   ;;  %s211_s1 = scalar_lea.vmem %s176_s16, 128  ;;  %p216_p1 = scmp.lt.s32.totalorder %s176_s16, %s176_s16 }
   0xf   :  { %135 = vmatprep.subr.bf16.mxu0 %v235_v1  ;;  %v16_v15 = vld [vmem:[%s314_s0] sm:$0xff]  ;;  %p212_p0 = scmp.ne.s32.totalorder %s176_s16, %s211_s1  ;;  %p217_p2 = scmp.lt.s32.totalorder %s211_s1, %s211_s1 }
  0x10   :  { %v18_v16 = vpack.c.bf16 %v16_v15, %v16_v15  ;;  %v183_v17 = vld [vmem:[%s316_s2] ss:$0 sm:$0xff] }
  0x11   :  { %p218_p3 = por %p217_p2, %p216_p1 }
  0x12   :  { %136 = vmatpush1.bf16.msra.mxu0 %v203_v7 }
  0x13   :  { %137 = vmatprep.subr.bf16.mxu0 %v235_v1  ;;  %p219_p4 = pnand %p218_p3, %p212_p0 }
  0x16   :  { %138 = vmatpush1.bf16.msra.mxu0 %v204_v8 }
  0x17   :  { %139 = vmatprep.subr.bf16.mxu0 %v235_v1 }
  0x1a   :  { %140 = vmatpush1.bf16.msra.mxu0 %v205_v9 }
  0x1b   :  { %141 = vmatprep.subr.bf16.mxu0 %v235_v1 }
  0x1e   :  { %142 = vmatpush1.bf16.msra.mxu0 %v206_v10 }
  0x1f   :  { %143 = vmatprep.subr.bf16.mxu0 %v235_v1 }
  0x22   :  { %144 = vmatpush1.bf16.msra.mxu0 %v207_v11 }
  0x23   :  { %145 = vmatprep.subr.bf16.mxu0 %v235_v1 }
  0x26   :  { %146 = vmatpush1.bf16.msra.mxu0 %v208_v12 }
  0x27   :  { %147 = vmatprep.subr.bf16.mxu0 %v235_v1 }
  0x2a   :  { %148 = vmatpush1.bf16.msra.mxu0 %v209_v13 }
  0x2b   :  { %149 = vmatprep.subr.bf16.mxu0 %v235_v1 }
  0x2e   :  { %150 = vmatpush1.bf16.msra.mxu0 %v210_v14 }
  0x31   :  { %160 = vmatmul.mubr.bf16.vlgmr.msra.gmra.mrb[0].mxu0 %v18_v16 }
 0x104   :  { %v161_v18 = vpop.f32.mrb[0].mxu0 }
 0x105   :  { %v162_v19 = vadd.f32 %v183_v17, %v161_v18  ;;  %v163_v20 = vpop.f32.mrb[1].mxu0 }
 0x106   :  { %v164_v21 = vpop.f32.mrb[2].mxu0 }
 0x107   :  { %v165_v22 = vpop.f32.mrb[3].mxu0  ;;  %168 = vst.msk [vmem:[#allocation2] sm:$0xff] %vm167_vm1, %v162_v19 }
 0x108   :  { %222 = shalt.err (!%p219_p4)
}
 0x109   :  { %s223_s2 = scalar_lea.hbm %s317_s3, 128 }
 0x10a   :  { %p224_p5 = scmp.ne.s32.totalorder %s317_s3, %s223_s2  ;;  %p227_p6 = scmp.lt.u32.totalorder %s223_s2, %s317_s3 }
 0x10c   :  { %p229_p7 = pnand %p227_p6, %p224_p5 }
 0x10e   :  { %232 = shalt.err (!%p229_p7)
}
 0x10f   :  { %178 = dma.vmem_to_hbm [thread:$0]  %s176_s16, 128, %s317_s3, [#allocation3]  }
 0x110   :  { %233 = dma.done.wait [#allocation3], 128  }
 0x111   :  { %234 = vsyncadd [#allocation3], 4294967168 }
 0x112   :  { %182 = vsyncpa [#allocation3], 1 }

</bundles_post_ra>
